<compile_context>
chip_gen: v6e
topology: v6e:2x2x1
jax: 0.10.0
libtpu: 0.0.40
codegen_flags: <defaults>
</compile_context>

<pallas_src>
import functools
import math

import jax
import jax.numpy as jnp
from jax.experimental import pallas as pl
from jax.experimental.pallas import tpu as pltpu


def _round_up(n, m):
    return ((n + m - 1) // m) * m


def _filter_kernel(x_ref, slab_ref, o_ref, *, num_layers, seq_len, hidden, kp,
                   off_c, off_dr, off_di, off_wr, off_wi, off_g, off_b):
    """One batch element, all layers fused; constants carved from one slab.

    x_ref    : (S, H)        this batch element's sequence (batch dim squeezed)
    slab_ref : (R, 128)      lane-dense constant slab, resident across the grid
    o_ref    : (S, H)        output block (aliases x's HBM buffer)
    """
    prec = jax.lax.Precision.HIGHEST
    x = x_ref[...]                                            # (S, H) f32

    # Loop-invariant bases (static slices of the resident constant slab).
    c = slab_ref[off_c:off_c + 2 * kp, :seq_len]              # (2Kp, S) [cos; -sin]
    d_r = slab_ref[off_dr:off_dr + seq_len, :kp]              # (S, Kp)  irfft Re basis
    d_i = slab_ref[off_di:off_di + seq_len, :kp]              # (S, Kp)  irfft Im basis

    # Static unroll: num_layers is small & compile-time known (use fori_loop
    # with dynamic layer indexing only if L grows beyond ~8).
    for layer in range(num_layers):
        # Merged analysis matmul: rows [0,Kp) = Re(rfft), [Kp,2Kp) = Im(rfft).
        f = jnp.dot(c, x, preferred_element_type=jnp.float32, precision=prec)
        xr = f[:kp]                                           # (Kp, H)
        xi = f[kp:]                                           # (Kp, H)

        # Complex multiply by the learned frequency-domain filter.
        wr = slab_ref[off_wr + layer * kp: off_wr + (layer + 1) * kp, :hidden]
        wi = slab_ref[off_wi + layer * kp: off_wi + (layer + 1) * kp, :hidden]
        y_re = xr * wr - xi * wi                              # Re(Y)
        y_im = xr * wi + xi * wr                              # Im(Y)

        # Split synthesis (ortho irfft) — avoids the sublane concat of [Re;Im].
        xf = (jnp.dot(d_r, y_re, preferred_element_type=jnp.float32, precision=prec)
              + jnp.dot(d_i, y_im, preferred_element_type=jnp.float32, precision=prec))

        # LayerNorm over hidden (eps=1e-12), affine.
        mean = jnp.mean(xf, axis=-1, keepdims=True)
        cen = xf - mean
        var = jnp.mean(cen * cen, axis=-1, keepdims=True)
        normed = cen * jax.lax.rsqrt(var + 1e-12)

        g = slab_ref[off_g + layer: off_g + layer + 1, :hidden]   # (1, H)
        b = slab_ref[off_b + layer: off_b + layer + 1, :hidden]   # (1, H)
        # TODO(synk): Dropout(p=0.1) treated as identity (eval mode).
        x = normed * g + b + x

    o_ref[...] = x


def pack_filter_params(seq_len, hidden, weights_r, weights_i, gammas, betas):
    """Build the single lane-dense constant slab + static layout metadata."""
    num_layers = len(weights_r)
    k = seq_len // 2 + 1                        # rfft freq_dim
    kp = _round_up(k, 8)                        # sublane-tile aligned freq_dim
    lanes = _round_up(max(seq_len, hidden, kp), 128)

    # Orthonormal rfft analysis / irfft synthesis bases.
    n = jnp.arange(seq_len, dtype=jnp.float32)
    kk = jnp.arange(k, dtype=jnp.float32)
    ang = 2.0 * math.pi * kk[:, None] * n[None, :] / seq_len          # (K, S)
    scale = 1.0 / math.sqrt(seq_len)
    cr = jnp.cos(ang) * scale                                         # Re analysis
    ci = -jnp.sin(ang) * scale                                        # Im analysis
    # Hermitian synthesis weighting: x2 for non-DC / non-Nyquist bins.
    mult = jnp.full((k,), 2.0, dtype=jnp.float32).at[0].set(1.0)
    if seq_len % 2 == 0:
        mult = mult.at[k - 1].set(1.0)
    dr = (jnp.cos(ang) * mult[:, None] * scale).T                     # (S, K) for Re(Y)
    di = (-jnp.sin(ang) * mult[:, None] * scale).T                    # (S, K) for Im(Y)

    # Merged analysis matrix [cos; -sin], zero-padded K -> Kp per half.
    analysis = jnp.zeros((2 * kp, seq_len), jnp.float32)
    analysis = analysis.at[:k, :].set(cr).at[kp:kp + k, :].set(ci)

    # Per-layer complex weights stacked layer-major, zero-padded K -> Kp.
    wr_all = jnp.zeros((num_layers * kp, hidden), jnp.float32)
    wi_all = jnp.zeros((num_layers * kp, hidden), jnp.float32)
    for l in range(num_layers):
        wr_all = wr_all.at[l * kp:l * kp + k, :].set(weights_r[l].reshape(k, hidden))
        wi_all = wi_all.at[l * kp:l * kp + k, :].set(weights_i[l].reshape(k, hidden))

    g_all = jnp.stack([g.reshape(hidden) for g in gammas])            # (L, H)
    b_all = jnp.stack([b.reshape(hidden) for b in betas])             # (L, H)

    # Concatenate all sections into one lane-dense slab; record row offsets.
    sections, offsets = [], {}
    row = 0

    def add(name, mat):
        nonlocal row
        r, c = mat.shape
        rp = _round_up(r, 8)                    # 8-aligned section starts
        block = jnp.zeros((rp, lanes), jnp.float32).at[:r, :c].set(mat)
        offsets[name] = row
        sections.append(block)
        row += rp

    add("c", analysis)     # (2Kp, S)
    add("dr", dr)          # (S, K)  -> lanes [0, Kp) used (padding zero)
    add("di", di)          # (S, K)
    add("wr", wr_all)      # (L*Kp, H)
    add("wi", wi_all)      # (L*Kp, H)
    add("g", g_all)        # (L, H)
    add("b", b_all)        # (L, H)

    slab = jnp.concatenate(sections, axis=0)    # (R, lanes) ≈ 40 KiB at toy size
    meta = dict(num_layers=num_layers, seq_len=seq_len, hidden=hidden, kp=kp,
                off_c=offsets["c"], off_dr=offsets["dr"], off_di=offsets["di"],
                off_wr=offsets["wr"], off_wi=offsets["wi"],
                off_g=offsets["g"], off_b=offsets["b"])
    return slab, meta


def make_filter_forward(meta):
    """Build the jitted forward fn; `meta` is static Python layout info."""
    seq_len, hidden = meta["seq_len"], meta["hidden"]
    kernel = functools.partial(
        _filter_kernel,
        num_layers=meta["num_layers"], seq_len=seq_len, hidden=hidden,
        kp=meta["kp"], off_c=meta["off_c"], off_dr=meta["off_dr"],
        off_di=meta["off_di"], off_wr=meta["off_wr"], off_wi=meta["off_wi"],
        off_g=meta["off_g"], off_b=meta["off_b"])

    def fwd(x, slab):
        batch = x.shape[0]
        return pl.pallas_call(
            kernel,
            out_shape=jax.ShapeDtypeStruct((batch, seq_len, hidden), jnp.float32),
            grid_spec=pltpu.PrefetchScalarGridSpec(
                num_scalar_prefetch=0,
                grid=(batch,),
                in_specs=[
                    # One batch element per grid step (batch dim squeezed).
                    pl.BlockSpec((None, seq_len, hidden), lambda b: (b, 0, 0)),
                    # Constant slab: same block every step -> DMA'd once.
                    pl.BlockSpec(slab.shape, lambda b: (0, 0)),
                ],
                out_specs=pl.BlockSpec((None, seq_len, hidden),
                                       lambda b: (b, 0, 0)),
            ),
            compiler_params=pltpu.CompilerParams(
                dimension_semantics=("parallel",)),   # v7x: split batch over TCs
            input_output_aliases={0: 0},              # x := f(x), in-place HBM
        )(x, slab)

    return jax.jit(fwd)


def _reference_forward(x, weights_r, weights_i, gammas, betas):
    """Pure-JAX reference (jnp.fft), mirrors the PyTorch module in eval mode."""
    for l in range(len(weights_r)):
        fx = jnp.fft.rfft(x, axis=1, norm="ortho")
        w = weights_r[l] + 1j * weights_i[l]
        fx = fx * w[None, :, :]
        xf = jnp.fft.irfft(fx, n=x.shape[1], axis=1, norm="ortho")
        mean = xf.mean(-1, keepdims=True)
        var = ((xf - mean) ** 2).mean(-1, keepdims=True)
        normed = (xf - mean) / jnp.sqrt(var + 1e-12)
        x = normed * gammas[l] + betas[l] + x
    return x


if __name__ == "__main__":
    key = jax.random.PRNGKey(0)
    batch, seq_len, hidden = 2, 8, 32
    num_layers = 2
    freq_dim = seq_len // 2 + 1

    kx, kw = jax.random.split(key)
    x = jax.random.normal(kx, (batch, seq_len, hidden), dtype=jnp.float32)

    # Parameter init mirroring the module:
    #   complex_weights[l]: (1, freq_dim, hidden) cfloat * 0.02 -> real/imag (K, H)
    #   LayerNorm: gamma=1, beta=0 (default nn.LayerNorm init)
    wkeys = jax.random.split(kw, 2 * num_layers)
    weights_r = [jax.random.normal(wkeys[2 * i], (freq_dim, hidden),
                                   jnp.float32) * 0.02 for i in range(num_layers)]
    weights_i = [jax.random.normal(wkeys[2 * i + 1], (freq_dim, hidden),
                                   jnp.float32) * 0.02 for i in range(num_layers)]
    gammas = [jnp.ones((hidden,), jnp.float32) for _ in range(num_layers)]
    betas = [jnp.zeros((hidden,), jnp.float32) for _ in range(num_layers)]

    slab, meta = pack_filter_params(seq_len, hidden,
                                    weights_r, weights_i, gammas, betas)
    fwd = make_filter_forward(meta)

    out = fwd(x, slab)
    jax.block_until_ready(out)
    assert out.shape == (batch, seq_len, hidden)

    # Self-check vs jnp.fft reference. With precision=HIGHEST on the in-kernel
    # matmuls the remaining deviation is FFT-vs-DFT rounding noise (~1e-6).
    ref = _reference_forward(x, weights_r, weights_i, gammas, betas)
    err = float(jnp.max(jnp.abs(out - ref)))
    assert err < 1e-3, f"max abs err vs reference: {err}"

    print("KERNEL_OK")
</pallas_src>

<mosaic_0001>
module attributes {stable_mosaic.version = 11 : i64} {
  func.func @_filter_kernel(%arg0: i32, %arg1: memref<1x8x32xf32, #tpu.memory_space<vmem>>, %arg2: memref<80x128xf32, #tpu.memory_space<vmem>>, %arg3: memref<1x8x32xf32, #tpu.memory_space<vmem>>) attributes {dimension_semantics = [#tpu.dimension_semantics<parallel>], iteration_bounds = array<i64: 2>, scalar_prefetch = 0 : i64, scratch_operands = 0 : i64, tpu.core_type = #tpu.core_type<tc>, window_params = [{transform_indices = @transform_0, window_bounds = array<i64: 1, 8, 32>}, {pipeline_mode = #tpu.pipeline_mode<synchronous>, transform_indices = @transform_1, window_bounds = array<i64: 80, 128>}, {transform_indices = @transform_2, window_bounds = array<i64: 1, 8, 32>}]} {
    %c0 = arith.constant 0 : index
    %c0_0 = arith.constant 0 : index
    %c0_1 = arith.constant 0 : index
    %0 = vector.load %arg1[%c0, %c0_0, %c0_1] : memref<1x8x32xf32, #tpu.memory_space<vmem>>, vector<1x8x32xf32>
    %1 = vector.shape_cast %0 : vector<1x8x32xf32> to vector<8x32xf32>
    %c0_2 = arith.constant 0 : index
    %c0_3 = arith.constant 0 : index
    %2 = vector.load %arg2[%c0_2, %c0_3] : memref<80x128xf32, #tpu.memory_space<vmem>>, vector<16x8xf32>
    %c16 = arith.constant 16 : index
    %c0_4 = arith.constant 0 : index
    %3 = vector.load %arg2[%c16, %c0_4] : memref<80x128xf32, #tpu.memory_space<vmem>>, vector<8x8xf32>
    %c24 = arith.constant 24 : index
    %c0_5 = arith.constant 0 : index
    %4 = vector.load %arg2[%c24, %c0_5] : memref<80x128xf32, #tpu.memory_space<vmem>>, vector<8x8xf32>
    %cst = arith.constant dense<0.000000e+00> : vector<16x32xf32>
    %5 = tpu.matmul %2, %1, %cst {dimension_numbers = #tpu.dot_dimension_numbers<[1], [0], [0], [1], [0, 0, 1, 1], [], []>, precision = #tpu.contract_precision<fp32>} : vector<16x8xf32>, vector<8x32xf32>, vector<16x32xf32> -> vector<16x32xf32>
    %6 = vector.extract_strided_slice %5 {offsets = [0, 0], sizes = [8, 32], strides = [1, 1]} : vector<16x32xf32> to vector<8x32xf32>
    %7 = vector.extract_strided_slice %5 {offsets = [8, 0], sizes = [8, 32], strides = [1, 1]} : vector<16x32xf32> to vector<8x32xf32>
    %c32 = arith.constant 32 : index
    %c0_6 = arith.constant 0 : index
    %8 = vector.load %arg2[%c32, %c0_6] : memref<80x128xf32, #tpu.memory_space<vmem>>, vector<8x32xf32>
    %c48 = arith.constant 48 : index
    %c0_7 = arith.constant 0 : index
    %9 = vector.load %arg2[%c48, %c0_7] : memref<80x128xf32, #tpu.memory_space<vmem>>, vector<8x32xf32>
    %10 = arith.mulf %6, %8 : vector<8x32xf32>
    %11 = arith.mulf %7, %9 : vector<8x32xf32>
    %12 = arith.subf %10, %11 : vector<8x32xf32>
    %13 = arith.mulf %6, %9 : vector<8x32xf32>
    %14 = arith.mulf %7, %8 : vector<8x32xf32>
    %15 = arith.addf %13, %14 : vector<8x32xf32>
    %cst_8 = arith.constant dense<0.000000e+00> : vector<8x32xf32>
    %16 = tpu.matmul %3, %12, %cst_8 {dimension_numbers = #tpu.dot_dimension_numbers<[1], [0], [0], [1], [0, 0, 1, 1], [], []>, precision = #tpu.contract_precision<fp32>} : vector<8x8xf32>, vector<8x32xf32>, vector<8x32xf32> -> vector<8x32xf32>
    %cst_9 = arith.constant dense<0.000000e+00> : vector<8x32xf32>
    %17 = tpu.matmul %4, %15, %cst_9 {dimension_numbers = #tpu.dot_dimension_numbers<[1], [0], [0], [1], [0, 0, 1, 1], [], []>, precision = #tpu.contract_precision<fp32>} : vector<8x8xf32>, vector<8x32xf32>, vector<8x32xf32> -> vector<8x32xf32>
    %18 = arith.addf %16, %17 : vector<8x32xf32>
    %cst_10 = arith.constant dense<0.000000e+00> : vector<8xf32>
    %19 = vector.multi_reduction <add>, %18, %cst_10 [1] : vector<8x32xf32> to vector<8xf32>
    %20 = vector.shape_cast %19 : vector<8xf32> to vector<8x1xf32>
    %cst_11 = arith.constant 3.200000e+01 : f32
    %21 = vector.broadcast %cst_11 : f32 to vector<8x1xf32>
    %22 = arith.divf %20, %21 : vector<8x1xf32>
    %23 = vector.broadcast %22 : vector<8x1xf32> to vector<8x32xf32>
    %24 = arith.subf %18, %23 : vector<8x32xf32>
    %25 = arith.mulf %24, %24 : vector<8x32xf32>
    %cst_12 = arith.constant dense<0.000000e+00> : vector<8xf32>
    %26 = vector.multi_reduction <add>, %25, %cst_12 [1] : vector<8x32xf32> to vector<8xf32>
    %27 = vector.shape_cast %26 : vector<8xf32> to vector<8x1xf32>
    %cst_13 = arith.constant 3.200000e+01 : f32
    %28 = vector.broadcast %cst_13 : f32 to vector<8x1xf32>
    %29 = arith.divf %27, %28 : vector<8x1xf32>
    %cst_14 = arith.constant 9.99999996E-13 : f32
    %30 = vector.broadcast %cst_14 : f32 to vector<8x1xf32>
    %31 = arith.addf %29, %30 : vector<8x1xf32>
    %32 = math.rsqrt %31 : vector<8x1xf32>
    %33 = vector.broadcast %32 : vector<8x1xf32> to vector<8x32xf32>
    %34 = arith.mulf %24, %33 : vector<8x32xf32>
    %c64 = arith.constant 64 : index
    %c0_15 = arith.constant 0 : index
    %35 = vector.load %arg2[%c64, %c0_15] : memref<80x128xf32, #tpu.memory_space<vmem>>, vector<1x32xf32>
    %c72 = arith.constant 72 : index
    %c0_16 = arith.constant 0 : index
    %36 = vector.load %arg2[%c72, %c0_16] : memref<80x128xf32, #tpu.memory_space<vmem>>, vector<1x32xf32>
    %37 = vector.broadcast %35 : vector<1x32xf32> to vector<8x32xf32>
    %38 = arith.mulf %34, %37 : vector<8x32xf32>
    %39 = vector.broadcast %36 : vector<1x32xf32> to vector<8x32xf32>
    %40 = arith.addf %38, %39 : vector<8x32xf32>
    %41 = arith.addf %40, %1 : vector<8x32xf32>
    %cst_17 = arith.constant dense<0.000000e+00> : vector<16x32xf32>
    %42 = tpu.matmul %2, %41, %cst_17 {dimension_numbers = #tpu.dot_dimension_numbers<[1], [0], [0], [1], [0, 0, 1, 1], [], []>, precision = #tpu.contract_precision<fp32>} : vector<16x8xf32>, vector<8x32xf32>, vector<16x32xf32> -> vector<16x32xf32>
    %43 = vector.extract_strided_slice %42 {offsets = [0, 0], sizes = [8, 32], strides = [1, 1]} : vector<16x32xf32> to vector<8x32xf32>
    %44 = vector.extract_strided_slice %42 {offsets = [8, 0], sizes = [8, 32], strides = [1, 1]} : vector<16x32xf32> to vector<8x32xf32>
    %c40 = arith.constant 40 : index
    %c0_18 = arith.constant 0 : index
    %45 = vector.load %arg2[%c40, %c0_18] : memref<80x128xf32, #tpu.memory_space<vmem>>, vector<8x32xf32>
    %c56 = arith.constant 56 : index
    %c0_19 = arith.constant 0 : index
    %46 = vector.load %arg2[%c56, %c0_19] : memref<80x128xf32, #tpu.memory_space<vmem>>, vector<8x32xf32>
    %47 = arith.mulf %43, %45 : vector<8x32xf32>
    %48 = arith.mulf %44, %46 : vector<8x32xf32>
    %49 = arith.subf %47, %48 : vector<8x32xf32>
    %50 = arith.mulf %43, %46 : vector<8x32xf32>
    %51 = arith.mulf %44, %45 : vector<8x32xf32>
    %52 = arith.addf %50, %51 : vector<8x32xf32>
    %cst_20 = arith.constant dense<0.000000e+00> : vector<8x32xf32>
    %53 = tpu.matmul %3, %49, %cst_20 {dimension_numbers = #tpu.dot_dimension_numbers<[1], [0], [0], [1], [0, 0, 1, 1], [], []>, precision = #tpu.contract_precision<fp32>} : vector<8x8xf32>, vector<8x32xf32>, vector<8x32xf32> -> vector<8x32xf32>
    %cst_21 = arith.constant dense<0.000000e+00> : vector<8x32xf32>
    %54 = tpu.matmul %4, %52, %cst_21 {dimension_numbers = #tpu.dot_dimension_numbers<[1], [0], [0], [1], [0, 0, 1, 1], [], []>, precision = #tpu.contract_precision<fp32>} : vector<8x8xf32>, vector<8x32xf32>, vector<8x32xf32> -> vector<8x32xf32>
    %55 = arith.addf %53, %54 : vector<8x32xf32>
    %cst_22 = arith.constant dense<0.000000e+00> : vector<8xf32>
    %56 = vector.multi_reduction <add>, %55, %cst_22 [1] : vector<8x32xf32> to vector<8xf32>
    %57 = vector.shape_cast %56 : vector<8xf32> to vector<8x1xf32>
    %cst_23 = arith.constant 3.200000e+01 : f32
    %58 = vector.broadcast %cst_23 : f32 to vector<8x1xf32>
    %59 = arith.divf %57, %58 : vector<8x1xf32>
    %60 = vector.broadcast %59 : vector<8x1xf32> to vector<8x32xf32>
    %61 = arith.subf %55, %60 : vector<8x32xf32>
    %62 = arith.mulf %61, %61 : vector<8x32xf32>
    %cst_24 = arith.constant dense<0.000000e+00> : vector<8xf32>
    %63 = vector.multi_reduction <add>, %62, %cst_24 [1] : vector<8x32xf32> to vector<8xf32>
    %64 = vector.shape_cast %63 : vector<8xf32> to vector<8x1xf32>
    %cst_25 = arith.constant 3.200000e+01 : f32
    %65 = vector.broadcast %cst_25 : f32 to vector<8x1xf32>
    %66 = arith.divf %64, %65 : vector<8x1xf32>
    %cst_26 = arith.constant 9.99999996E-13 : f32
    %67 = vector.broadcast %cst_26 : f32 to vector<8x1xf32>
    %68 = arith.addf %66, %67 : vector<8x1xf32>
    %69 = math.rsqrt %68 : vector<8x1xf32>
    %70 = vector.broadcast %69 : vector<8x1xf32> to vector<8x32xf32>
    %71 = arith.mulf %61, %70 : vector<8x32xf32>
    %c65 = arith.constant 65 : index
    %c0_27 = arith.constant 0 : index
    %72 = vector.load %arg2[%c65, %c0_27] : memref<80x128xf32, #tpu.memory_space<vmem>>, vector<1x32xf32>
    %c73 = arith.constant 73 : index
    %c0_28 = arith.constant 0 : index
    %73 = vector.load %arg2[%c73, %c0_28] : memref<80x128xf32, #tpu.memory_space<vmem>>, vector<1x32xf32>
    %74 = vector.broadcast %72 : vector<1x32xf32> to vector<8x32xf32>
    %75 = arith.mulf %71, %74 : vector<8x32xf32>
    %76 = vector.broadcast %73 : vector<1x32xf32> to vector<8x32xf32>
    %77 = arith.addf %75, %76 : vector<8x32xf32>
    %78 = arith.addf %77, %41 : vector<8x32xf32>
    %c0_29 = arith.constant 0 : index
    %c0_30 = arith.constant 0 : index
    %c0_31 = arith.constant 0 : index
    %79 = vector.load %arg3[%c0_29, %c0_30, %c0_31] : memref<1x8x32xf32, #tpu.memory_space<vmem>>, vector<1x8x32xf32>
    %80 = vector.shape_cast %79 : vector<1x8x32xf32> to vector<8x32xf32>
    %81 = vector.shape_cast %78 : vector<8x32xf32> to vector<1x8x32xf32>
    tpu.vector_store %arg3[%c0_29, %c0_30, %c0_31], %81 {strides = array<i32>} : memref<1x8x32xf32, #tpu.memory_space<vmem>>, vector<1x8x32xf32>,
    return
  }
  func.func @transform_0(%arg0: i32) -> (i32, i32, i32) {
    %c0_i32 = arith.constant 0 : i32
    %c0_i32_0 = arith.constant 0 : i32
    %c0_i32_1 = arith.constant 0 : i32
    return %arg0, %c0_i32, %c0_i32_0 : i32, i32, i32
  }
  func.func @transform_1(%arg0: i32) -> (i32, i32) {
    %c0_i32 = arith.constant 0 : i32
    %c0_i32_0 = arith.constant 0 : i32
    %c0_i32_1 = arith.constant 0 : i32
    return %c0_i32, %c0_i32_0 : i32, i32
  }
  func.func @transform_2(%arg0: i32) -> (i32, i32, i32) {
    %c0_i32 = arith.constant 0 : i32
    %c0_i32_0 = arith.constant 0 : i32
    %c0_i32_1 = arith.constant 0 : i32
    return %arg0, %c0_i32, %c0_i32_0 : i32, i32, i32
  }
}

</mosaic_0001>

<bundles_post_ra>
// kernel: fwd.1
= control target key start
LH: loop header
LB: loop body
LE: loop exit
PB: predicated region body
PF: predicated region fallthrough
CT: control target
= control target key end

     0   :  { %7 = vsyncpa [#allocation3], 0  ;;  %s3957_s0 = inlined_call_operand.hbm [shape: f32[2,8,32], index: 0, kind: input, shape index: {}, may-alias: {0,2}]   ;;  %s3958_s1 = inlined_call_operand.hbm [shape: f32[80,128], index: 1, kind: input, shape index: {}]   ;;  %s3959_s2 = inlined_call_operand.hbm [shape: f32[2,8,32], index: 2, kind: output, shape index: {}, may-alias: {0,2}]  }
   0x1   :  { %9 = vsyncpa [#allocation3 + $0x1], 0 }
   0x2   :  { %10 = vsyncpa [#allocation6], 0 }
   0x3   :  { %11 = vsyncpa [#allocation4], 0 }
   0x4   :  { %13 = vsyncpa [#allocation4 + $0x1], 0  ;;  %s3612_s9 = smov 0   ;;  %s3614_s10 = smov 0  }
   0x5   :  { %s3616_s11 = smov 0   ;;  %s3618_s12 = smov 0  }
   0x6 LB: > { %s3633_s13 = sadd.s32 4294967295, %s3588_s12   ;;  %s3119_s14 = sadd.s32 4294967294, %s3588_s12   ;;  %s3588_s12 = sphi %s3618_s12, %s3981_s12   ;;  %s3584_s11 = sphi %s3616_s11, %s3980_s11   ;;  %s3580_s10 = sphi %s3614_s10, %s3979_s10   ;;  %s3576_s9 = sphi %s3612_s9, %s3978_s9  }
   0x7   : > { %p39_p0 = scmp.ne.s32.totalorder %s3580_s10, %s3576_s9  ;;  %p3960_p1 = scmp.eq.s32.totalorder %s3633_s13, 0 }
   0x8   : > { %p90_p3 = scmp.eq.s32.totalorder %s3119_s14, 1  ;;  %p3120_p5 = scmp.ge.s32.totalorder %s3588_s12, 1 }
   0x9   : > { %p3642_p4 = por %p3960_p1, %p39_p0  ;;  %p97_p7 = scmp.lt.s32.totalorder %s3588_s12, 3 }
   0xa   : > { %p3647_p6 = por %p90_p3, %p39_p0  ;;  %s3590_s18 = smov [#allocation5]  }
   0xb   : > { %s3964_s15 = scalar_select %p3642_p4, 1, 0 }
   0xc   : > { %s3965_s16 = scalar_select %p3647_p6, 1, 0 }
   0xd   : > { %p3652_p8 = pnand %p3120_p5, %p97_p7  ;;  %s109_s19 = sshll.u32 %s3590_s18, 4  ;;  %s110_s19 = int_to_ptr.vmem [resolvable:$true] %s109_s19 }
   0xe   : > { %s3666_s21 = sadd.s32 1, %s3588_s12   ;;  %s26_s22 = sadd.s32 1, %s3584_s11 }
   0xf   : > { %s3966_s17 = scalar_select %p3652_p8, 1, 0 }
  0x10   : > { %p3409_p9 = pneg %p3652_p8  ;;  %s23_s23 = ssub.s32 %s3588_s12, %s3666_s21 }
  0x11   : > { %s3477_s24 = scalar_lea.vmem %s110_s19, 1280  ;;  %p3485_p5 = scmp.lt.s32.totalorder %s110_s19, %s110_s19 }
  0x12   : > { %p3661_p11 = pnand %p3409_p9, %p3960_p1  ;;  %p3478_p13 = scmp.ne.s32.totalorder %s110_s19, %s3477_s24 }
  0x13   : > { %p3486_p7 = scmp.lt.s32.totalorder %s3477_s24, %s3477_s24 }
  0x14   : > { %p3468_p12 = pneg %p3661_p11 }
  0x15   : > { %p3487_p10 = por %p3486_p7, %p3485_p5 }
  0x16   : > { %p3480_p0 = pnand %p3478_p13, %p3468_p12 }
  0x18   : > { %p3481_p3 = pneg %p3480_p0 }
  0x1a   : > { %p3488_p2 = pnand %p3487_p10, %p3481_p3 }
  0x1c   : > { %3491 = shalt.err (!%p3488_p2)
}
  0x1d   : > { %s3591_s25 = smov 128   ;;  %s3592_s26 = smov 8  }
  0x1e   : > { %3412 = dma.hbm_to_vmem [thread:$0]  (!%p3661_p11), %s3958_s1, 1280, %s110_s19, [#allocation6], %s3591_s25, %s3591_s25, %s3592_s26  }
  0x1f   : > { %p24_p9 = scmp.eq.s32.totalorder %s23_s23, 0  ;;  %p33_p12 = scmp.ne.s32.totalorder %s3584_s11, %s3580_s10 }
  0x20   : > { %p34_p10 = scmp.eq.s32.totalorder %s3588_s12, 0  ;;  %p3422_p2 = scmp.lt.s32.totalorder %s3588_s12, 2 }
  0x21   : > { %s3683_s29 = scalar_select %p24_p9, %s3584_s11, %s26_s22  }
  0x22   : > { %p35_p13 = por %p34_p10, %p33_p12  ;;  %p3968_p0 = scmp.eq.s32.totalorder %s3633_s13, 1 }
  0x23   : > { %s123_s3 = sand.u32 1, %s3584_s11   ;;  %s3124_s4 = sshll.u32 %s3588_s12, 7 }
  0x24   : > { %p3687_p3 = por %p3968_p0, %p33_p12  ;;  %s3123_s5 = sshll.u32 %s123_s3, 3 }
  0x25   : > { %s3696_s8 = scalar_lea.hbm %s3957_s0, %s3124_s4  ;;  %s127_s14 = scalar_lea.vmem [#allocation2], %s3123_s5 }
  0x26   : > { %s3969_s30 = scalar_select %p3687_p3, 1, 0 }
  0x27   : > { %s134_s18 = sshll.u32 %s127_s14, 4  ;;  %p3698_p11 = pnand %p3422_p2, %p35_p13  ;;  %s135_s18 = int_to_ptr.vmem [resolvable:$true] %s134_s18 }
  0x28   : > { %s124_s20 = scalar_lea.sflag [#allocation3], %s123_s3  ;;  %s3492_s22 = scalar_lea.hbm %s3696_s8, 128 }
  0x29   : > { %p3493_p5 = scmp.ne.s32.totalorder %s3696_s8, %s3492_s22  ;;  %p3494_p7 = pneg %p3698_p11 }
  0x2a   : > { %s3497_s25 = scalar_lea.hbm %s3957_s0, 256  ;;  %p3498_p10 = scmp.lt.s32.totalorder %s3696_s8, %s3957_s0 }
  0x2b   : > { %p3495_p9 = pnand %p3494_p7, %p3493_p5  ;;  %p3499_p2 = scmp.lt.s32.totalorder %s3497_s25, %s3492_s22 }
  0x2d   : > { %p3496_p12 = pneg %p3495_p9  ;;  %p3500_p13 = por %p3499_p2, %p3498_p10 }
  0x2f   : > { %p3501_p0 = pnand %p3500_p13, %p3496_p12 }
  0x31   : > { %3504 = shalt.err (!%p3501_p0)
}
  0x32   : > { %s3505_s28 = scalar_lea.vmem %s135_s18, 128  ;;  %s3593_s3 = smov [#allocation2]  }
  0x33   : > { %p3506_p1 = scmp.ne.s32.totalorder %s135_s18, %s3505_s28  ;;  %s3510_s4 = sshll.u32 %s3593_s3, 4  ;;  %s3511_s4 = int_to_ptr.vmem [resolvable:$false] %s3510_s4 }
  0x34   : > { %s3512_s5 = scalar_lea.vmem %s3511_s4, 256  ;;  %p3513_p5 = scmp.lt.s32.totalorder %s135_s18, %s3511_s4 }
  0x35   : > { %p3508_p6 = pnand %p3506_p1, %p3494_p7  ;;  %p3514_p9 = scmp.lt.s32.totalorder %s3512_s5, %s3505_s28 }
  0x37   : > { %p3509_p3 = pneg %p3508_p6  ;;  %p3515_p4 = por %p3514_p9, %p3513_p5 }
  0x39   : > { %p3516_p8 = pnand %p3515_p4, %p3509_p3 }
  0x3b   : > { %3519 = shalt.err (!%p3516_p8)
}
  0x3c   : > { %3416 = dma.hbm_to_vmem [thread:$0]  (!%p3698_p11), %s3696_s8, 128, %s135_s18, %s124_s20  }
  0x3d   : > { %p3971_p12 = scmp.ne.s32.totalorder %s3966_s17, 0 }
  0x3e   : > { %s3719_s6 = sand.u32 (!%p3971_p12), 1, %s3580_s10   ;;  %p3972_p1 = scmp.ne.s32.totalorder (!%p3971_p12), %s3964_s15, 0 }
  0x3f   : > { %143 = sbr.rel (%p3971_p12) target bundleno = 1602 (0x642), region = 28  ;;  %s3126_s7 = sshll.u32 (!%p3971_p12), %s3719_s6, 3 }
  0x40   : > { %s146_s14 = scalar_lea.sflag (!%p3971_p12), [#allocation3], %s3719_s6  ;;  %s149_s22 = scalar_lea.vmem (!%p3971_p12), [#allocation2], %s3126_s7 }
  0x44   : > { %3563 = dma.done.wait (%p3972_p1), %s146_s14, 128  }
  0x45   : > { %3565 = vsyncadd (%p3972_p1), %s146_s14, 4294967168  ;;  %p3973_p4 = scmp.eq.s32.totalorder %s3633_s13, 0 }
  0x47   : > { %3567 = dma.done.wait (%p3973_p4), [#allocation6], 1280   ;;  %p3974_p6 = pmov %p3973_p4 }
  0x48   : > { %vm179_vm0 = vcmask 64512   ;;  %v3733_v0 = vld [vmem:[%s149_s22] sm:$0xff]  ;;  %v175_v1 = vld [vmem:[#allocation5] sm:$0xff]  ;;  %v176_v2 = vld [vmem:[#allocation5 + $0x8] sm:$0xff]  ;;  %v3594_v20 = vmov 0.0   ;;  %vm3595_vm1 = vmmov 0  }
  0x49   : > { %3569 = vsyncadd (%p3974_p6), [#allocation6], 4294966016  ;;  %v217_v3 = vand.u32 4294901760, %v3733_v0  ;;  %v181_v4 = vsel %vm179_vm0, %v175_v1, 0  ;;  %v184_v5 = vsel %vm179_vm0, %v176_v2, 0  ;;  %v178_v21 = vld [vmem:[#allocation5 + $0x18] sm:$0xff] }
  0x4a   : > { %v3738_v6 = vand.u32 4294901760, %v181_v4  ;;  %v3740_v7 = vand.u32 4294901760, %v184_v5  ;;  %v684_v22 = vsel %vm179_vm0, %v178_v21, 0  ;;  %v177_v40 = vld [vmem:[#allocation5 + $0x10] sm:$0xff]  ;;  %v675_v48 = vld [vmem:[#allocation5 + $0x20] sm:$0xff]  ;;  %vm1581_vm2 = vcmask 261120  }
  0x4b   : > { %3221 = vmatprep.subr.mxu0 %v217_v3  ;;  %v304_v8 = vsub.f32 %v3733_v0, %v217_v3  ;;  %v3782_v27 = vand.u32 4294901760, %v684_v22  ;;  %v1133_v47 = vsel %vm179_vm0, %v177_v40, 0  ;;  %v676_v49 = vld [vmem:[#allocation5 + $0x30] sm:$0xff]  ;;  %s3134_s15 = sshll.u32 %s3633_s13, 7  ;;  %s173_s17 = scalar_lea.vmem [#allocation7], %s3126_s7 }
  0x4c   : > { %3222 = vmatpush3.msra.mxu0 %v217_v3  ;;  %v3744_v9 = vsub.f32 %v181_v4, %v3738_v6  ;;  %3228 = vmatprep.mubr.f32.mxu1 %v3738_v6  ;;  %v3748_v10 = vsub.f32 %v184_v5, %v3740_v7  ;;  %v3793_v53 = vand.u32 4294901760, %v1133_v47  ;;  %s3039_s8 = sshll.u32 %s173_s17, 4  ;;  %s3037_s20 = scalar_lea.hbm %s3959_s2, %s3134_s15  ;;  %s3040_s8 = int_to_ptr.vmem [resolvable:$true] %s3039_s8 }
  0x4d   : > { %v305_v11 = vand.u32 4294901760, %v304_v8  ;;  %3231 = vmatprep.subr.mxu0 %v304_v8  ;;  %v3785_v35 = vsub.f32 %v684_v22, %v3782_v27  ;;  %s3026_s23 = scalar_lea.sflag [#allocation4], %s3719_s6  ;;  %s3520_s24 = scalar_lea.vmem %s3040_s8, 128 }
  0x4e   : > { %v3751_v12 = vand.u32 4294901760, %v3744_v9  ;;  %v3754_v13 = vand.u32 4294901760, %v3748_v10  ;;  %v3798_v62 = vsub.f32 %v1133_v47, %v3793_v53  ;;  %p3521_p8 = scmp.ne.s32.totalorder %s3040_s8, %s3520_s24  ;;  %p3975_p3 = scmp.ne.s32.totalorder %s3969_s30, 0 }
  0x4f   : > { %v306_v14 = vsub.f32 %v304_v8, %v305_v11  ;;  %v3788_v44 = vand.u32 4294901760, %v3785_v35  ;;  %s3596_s13 = smov [#allocation7]  }
  0x50   : > { %v255_v15 = vsub.f32 %v3744_v9, %v3751_v12  ;;  %v265_v16 = vsub.f32 %v3748_v10, %v3754_v13  ;;  %p3522_p11 = pnand %p3521_p8, %p3975_p3  ;;  %s3524_s25 = sshll.u32 %s3596_s13, 4  ;;  %s3525_s25 = int_to_ptr.vmem [resolvable:$false] %s3524_s25 }
  0x51   : > { %v307_v17 = vand.u32 4294901760, %v306_v14  ;;  %v755_v52 = vsub.f32 %v3785_v35, %v3788_v44  ;;  %s3526_s26 = scalar_lea.vmem %s3525_s25, 256  ;;  %p3527_p10 = scmp.lt.s32.totalorder %s3040_s8, %s3525_s25 }
  0x52   : > { %v3760_v18 = vand.u32 4294901760, %v255_v15  ;;  %v3762_v19 = vand.u32 4294901760, %v265_v16  ;;  %p3523_p7 = pneg %p3522_p11  ;;  %p3528_p2 = scmp.lt.s32.totalorder %s3526_s26, %s3520_s24 }
  0x53   : > { %3226 = vmatprep.subr.mxu1 %v307_v17  ;;  %v3795_v60 = vand.u32 4294901760, %v755_v52 }
  0x54   : > { %3223 = vmatprep.mubr.f32.mxu0 %v3760_v18  ;;  %3227 = vmatpush3.msra.mxu1 %v307_v17  ;;  %p3529_p13 = por %p3528_p2, %p3527_p10 }
  0x55   : > { %3224 = vmatmul.mubr.f32.vlgmr.msra.gmra.mxu0 %v3762_v19  ;;  %3229 = vmatmul.mubr.f32.vlgmr.msra.gmra.mxu1 %v3740_v7 }
  0x56   : > { %3236 = vmatprep.subr.mxu1 %v217_v3  ;;  %3232 = vmatpush3.msra.mxu0 %v304_v8  ;;  %p3530_p0 = pnand %p3529_p13, %p3523_p7 }
  0x57   : > { %3233 = vmatprep.mubr.f32.mxu0 %v3744_v9  ;;  %3237 = vmatpush3.msra.mxu1 %v217_v3 }
  0x58   : > { %3238 = vmatprep.mubr.f32.mxu1 %v3751_v12  ;;  %3241 = vmatprep.subr.mxu0 %v305_v11 }
  0x59   : > { %3234 = vmatmul.mubr.f32.vlgmr.msra.gmra.mxu0 %v3748_v10  ;;  %3239 = vmatmul.mubr.f32.vlgmr.msra.gmra.mxu1 %v3754_v13 }
  0x5a   : > { %3246 = vmatprep.subr.mxu1 %v217_v3  ;;  %3242 = vmatpush3.msra.mxu0 %v305_v11 }
  0x5b   : > { %3243 = vmatprep.mubr.f32.mxu0 %v3738_v6  ;;  %3247 = vmatpush3.msra.mxu1 %v217_v3  ;;  %v3805_v3 = vand.u32 4294901760, %v3798_v62 }
  0x5c   : > { %3248 = vmatprep.mubr.f32.mxu1 %v3738_v6  ;;  %3251 = vmatprep.subr.mxu0 %v3594_v20 }
  0x5d   : > { %3244 = vmatmul.mubr.f32.vlgmr.msra.gmra.mxu0 %v3740_v7  ;;  %3249 = vmatmul.mubr.f32.vlgmr.msra.gmra.mxu1 %v3740_v7  ;;  %v1204_v11 = vsub.f32 %v3798_v62, %v3805_v3 }
  0x5e   : > { %3256 = vmatprep.subr.mxu1 %v3594_v20  ;;  %3253 = vmatprep.mubr.msk.f32.mxu0 %vm3595_vm1, %v3594_v20 }
  0x5f   : > { %3258 = vmatprep.mubr.msk.f32.mxu1 %vm3595_vm1, %v3594_v20  ;;  %v3817_v15 = vand.u32 4294901760, %v1204_v11 }
 0x115   : > { %v3225_v23 = vpop.f32.mrf.mxu0  ;;  %v3230_v24 = vpop.f32.mrf.mxu1 }
 0x116   : > { %v351_v28 = vadd.f32 %v3230_v24, %v3225_v23 }
 0x117   : > { %v258_v25 = vpop.f32.mrf.mxu0  ;;  %v344_v26 = vpop.f32.mrf.mxu1 }
 0x118   : > { %v345_v31 = vadd.f32 %v344_v26, %v258_v25 }
 0x119   : > { %v3235_v29 = vpop.f32.mrf.mxu0  ;;  %v3240_v30 = vpop.f32.mrf.mxu1 }
 0x11a   : > { %v432_v32 = vadd.f32 %v3235_v29, %v351_v28 }
 0x11b   : > { %v424_v33 = vpop.f32.mrf.mxu0  ;;  %v505_v34 = vpop.f32.mrf.mxu1 }
 0x11c   : > { %v514_v36 = vadd.f32 %v3240_v30, %v432_v32  ;;  %v425_v37 = vadd.f32 %v424_v33, %v345_v31 }
 0x11d   : > { %v3245_v38 = vpop.f32.mrf.mxu0  ;;  %v3250_v39 = vpop.f32.mrf.mxu1 }
 0x11e   : > { %v506_v41 = vadd.f32 %v505_v34, %v425_v37  ;;  %v594_v42 = vadd.f32 %v3245_v38, %v514_v36 }
 0x11f   : > { %v587_v43 = vpop.f32.mrf.mxu0  ;;  %v665_v50 = vpop.f32.mrf.mxu1 }
 0x120   : > { %v672_v45 = vadd.f32 %v3250_v39, %v594_v42  ;;  %v588_v46 = vadd.f32 %v587_v43, %v506_v41 }
 0x122   : > { %v666_v51 = vadd.f32 %v665_v50, %v588_v46  ;;  %v678_v54 = vmul.f32 %v676_v49, %v672_v45  ;;  %v681_v55 = vmul.f32 %v675_v48, %v672_v45 }
 0x124   : > { %v677_v56 = vmul.f32 %v675_v48, %v666_v51  ;;  %v680_v57 = vmul.f32 %v676_v49, %v666_v51 }
 0x126   : > { %v679_v58 = vsub.f32 %v677_v56, %v678_v54  ;;  %v682_v59 = vadd.f32 %v681_v55, %v680_v57 }
 0x128   : > { %v717_v61 = vand.u32 4294901760, %v682_v59  ;;  %v1166_v1 = vand.u32 4294901760, %v679_v58 }
 0x12a   : > { %v794_v63 = vsub.f32 %v682_v59, %v717_v61  ;;  %3252 = vmatpush3.msra.mxu0 %v717_v61  ;;  %v1243_v4 = vsub.f32 %v679_v58, %v1166_v1 }
 0x12b   : > { %3254 = vmatmul.mubr.f32.vlgmr.msra.gmra.mxu0 %v3795_v60  ;;  %3261 = vmatprep.subr.mxu0 %v3594_v20 }
 0x12c   : > { %3262 = vmatpush3.msra.mxu0 %v794_v63  ;;  %3263 = vmatprep.mubr.msk.f32.mxu0 %vm3595_vm1, %v3594_v20  ;;  %v795_v2 = vand.u32 4294901760, %v794_v63  ;;  %v1244_v14 = vand.u32 4294901760, %v1243_v4 }
 0x12d   : > { %3271 = vmatprep.subr.mxu0 %v3594_v20 }
 0x12e   : > { %v796_v5 = vsub.f32 %v794_v63, %v795_v2  ;;  %v1245_v16 = vsub.f32 %v1243_v4, %v1244_v14 }
 0x12f   : > { %3264 = vmatmul.mubr.f32.vlgmr.msra.gmra.mxu0 %v3785_v35 }
 0x130   : > { %3272 = vmatpush3.msra.mxu0 %v795_v2  ;;  %v797_v8 = vand.u32 4294901760, %v796_v5  ;;  %3273 = vmatprep.mubr.msk.f32.mxu0 %vm3595_vm1, %v3594_v20  ;;  %v1246_v17 = vand.u32 4294901760, %v1245_v16  ;;  %v3129_v16 = vld [vmem:[#allocation5 + $0x40] ss:$0 sm:$0xff] }
 0x131   : > { %3281 = vmatprep.subr.mxu0 %v3594_v20 }
 0x132   : > { %3257 = vmatpush3.msra.mxu1 %v797_v8 }
 0x133   : > { %3259 = vmatmul.mubr.f32.vlgmr.msra.gmra.mxu1 %v3782_v27  ;;  %3266 = vmatprep.subr.mxu1 %v3594_v20 }
 0x134   : > { %3274 = vmatmul.mubr.f32.vlgmr.msra.gmra.mxu0 %v3782_v27  ;;  %3267 = vmatpush3.msra.mxu1 %v717_v61 }
 0x135   : > { %3282 = vmatpush3.msra.mxu0 %v1166_v1  ;;  %3268 = vmatprep.mubr.msk.f32.mxu1 %vm3595_vm1, %v3594_v20 }
 0x136   : > { %3276 = vmatprep.subr.mxu1 %v3594_v20  ;;  %3283 = vmatprep.mubr.msk.f32.mxu0 %vm3595_vm1, %v3594_v20 }
 0x137   : > { %3291 = vmatprep.subr.mxu0 %v3594_v20  ;;  %3269 = vmatmul.mubr.f32.vlgmr.msra.gmra.mxu1 %v3788_v44 }
 0x138   : > { %3277 = vmatpush3.msra.mxu1 %v717_v61  ;;  %3284 = vmatmul.mubr.f32.vlgmr.msra.gmra.mxu0 %v3817_v15 }
 0x139   : > { %3292 = vmatpush3.msra.mxu0 %v1243_v4  ;;  %3278 = vmatprep.mubr.msk.f32.mxu1 %vm3595_vm1, %v3594_v20 }
 0x13a   : > { %3286 = vmatprep.subr.mxu1 %v3594_v20  ;;  %3293 = vmatprep.mubr.msk.f32.mxu0 %vm3595_vm1, %v3594_v20 }
 0x13b   : > { %3301 = vmatprep.subr.mxu0 %v3594_v20  ;;  %3279 = vmatmul.mubr.f32.vlgmr.msra.gmra.mxu1 %v3782_v27 }
 0x13c   : > { %3287 = vmatpush3.msra.mxu1 %v1246_v17  ;;  %3294 = vmatmul.mubr.f32.vlgmr.msra.gmra.mxu0 %v3798_v62 }
 0x13d   : > { %3302 = vmatpush3.msra.mxu0 %v1244_v14  ;;  %3288 = vmatprep.mubr.msk.f32.mxu1 %vm3595_vm1, %v3594_v20 }
 0x13e   : > { %3296 = vmatprep.subr.mxu1 %v3594_v20  ;;  %3303 = vmatprep.mubr.msk.f32.mxu0 %vm3595_vm1, %v3594_v20 }
 0x13f   : > { %3289 = vmatmul.mubr.f32.vlgmr.msra.gmra.mxu1 %v3793_v53 }
 0x140   : > { %3297 = vmatpush3.msra.mxu1 %v1166_v1  ;;  %3298 = vmatprep.mubr.msk.f32.mxu1 %vm3595_vm1, %v3594_v20 }
 0x141   : > { %3306 = vmatprep.subr.mxu1 %v3594_v20  ;;  %3304 = vmatmul.mubr.f32.vlgmr.msra.gmra.mxu0 %v3793_v53 }
 0x142   : > { %3313 = vmatprep.mubr.f32.mxu0 %v3760_v18 }
 0x143   : > { %3299 = vmatmul.mubr.f32.vlgmr.msra.gmra.mxu1 %v3805_v3 }
 0x144   : > { %3307 = vmatpush3.msra.mxu1 %v1166_v1  ;;  %3308 = vmatprep.mubr.msk.f32.mxu1 %vm3595_vm1, %v3594_v20 }
 0x147   : > { %3309 = vmatmul.mubr.f32.vlgmr.msra.gmra.mxu1 %v3793_v53 }
 0x148   : > { %3318 = vmatprep.mubr.f32.mxu1 %v3738_v6 }
 0x1eb   : > { %v758_v21 = vpop.f32.mrf.mxu0 }
 0x1ed   : > { %v3255_v22 = vpop.f32.mrf.mxu0 }
 0x1ef   : > { %v908_v23 = vpop.f32.mrf.mxu0 }
 0x1f1   : > { %v3265_v24 = vpop.f32.mrf.mxu0 }
 0x1f3   : > { %v834_v25 = vpop.f32.mrf.mxu1 }
 0x1f4   : > { %v835_v26 = vadd.f32 %v834_v25, %v758_v21  ;;  %v1056_v28 = vpop.f32.mrf.mxu0  ;;  %v3130_v21 = vld [vmem:[#allocation5 + $0x48] ss:$0 sm:$0xff] }
 0x1f5   : > { %v3260_v29 = vpop.f32.mrf.mxu1 }
 0x1f6   : > { %v909_v30 = vadd.f32 %v908_v23, %v835_v26  ;;  %v3275_v18 = vpop.f32.mrf.mxu0 }
 0x1f7   : > { %v982_v31 = vpop.f32.mrf.mxu1 }
 0x1f8   : > { %v983_v32 = vadd.f32 %v982_v31, %v909_v30  ;;  %v1207_v33 = vpop.f32.mrf.mxu0 }
 0x1f9   : > { %v3270_v34 = vpop.f32.mrf.mxu1 }
 0x1fa   : > { %v1057_v36 = vadd.f32 %v1056_v28, %v983_v32  ;;  %v3285_v37 = vpop.f32.mrf.mxu0 }
 0x1fb   : > { %v1128_v38 = vpop.f32.mrf.mxu1 }
 0x1fc   : > { %v1129_v39 = vadd.f32 %v1128_v38, %v1057_v36  ;;  %v1357_v40 = vpop.f32.mrf.mxu0 }
 0x1fd   : > { %v3280_v41 = vpop.f32.mrf.mxu1 }
 0x1fe   : > { %v1208_v42 = vadd.f32 %v1207_v33, %v1129_v39  ;;  %v3295_v43 = vpop.f32.mrf.mxu0 }
 0x1ff   : > { %v1283_v45 = vpop.f32.mrf.mxu1  ;;  %v2098_v43 = vld [vmem:[#allocation5 + $0x28] sm:$0xff] }
 0x200   : > { %v1284_v46 = vadd.f32 %v1283_v45, %v1208_v42  ;;  %v2099_v45 = vld [vmem:[#allocation5 + $0x38] sm:$0xff] }
 0x201   : > { %v3290_v47 = vpop.f32.mrf.mxu1  ;;  %v1505_v48 = vpop.f32.mrf.mxu0 }
 0x202   : > { %v1358_v49 = vadd.f32 %v1357_v40, %v1284_v46 }
 0x203   : > { %v1431_v50 = vpop.f32.mrf.mxu1  ;;  %v3305_v51 = vpop.f32.mrf.mxu0 }
 0x204   : > { %v1432_v52 = vadd.f32 %v1431_v50, %v1358_v49 }
 0x205   : > { %v3300_v54 = vpop.f32.mrf.mxu1 }
 0x206   : > { %v1506_v55 = vadd.f32 %v1505_v48, %v1432_v52 }
 0x207   : > { %v1577_v56 = vpop.f32.mrf.mxu1 }
 0x208   : > { %v1578_v57 = vadd.f32 %v1577_v56, %v1506_v55 }
 0x209   : > { %v3310_v58 = vpop.f32.mrf.mxu1 }
 0x20a   : > { %v1582_v59 = vsel %vm1581_vm2, %v1578_v57, 0.0 }
 0x20b   : > { %1583 = vadd.xlane.f32.xlu0 %v1582_v59 }
 0x294   : > { %v1584_v61 = vpop.xlane.xlu0 %1583 }
 0x295   : > { %v1586_v63 = vmul.f32 0.03125, %v1584_v61 }
 0x297   : > { %v1587_v1 = vsub.f32 %v1578_v57, %v1586_v63 }
 0x299   : > { %v1588_v2 = vmul.f32 %v1587_v1, %v1587_v1 }
 0x29b   : > { %v1589_v4 = vsel %vm1581_vm2, %v1588_v2, 0.0 }
 0x29c   : > { %1590 = vadd.xlane.f32.xlu0 %v1589_v4 }
 0x325   : > { %v1591_v5 = vpop.xlane.xlu0 %1590 }
 0x326   : > { %v1592_v8 = vmul.f32 0.03125, %v1591_v5 }
 0x328   : > { %v1593_v11 = vadd.f32 1e-12, %v1592_v8 }
 0x32a   : > { %3462 = vrsqrt.f32 %v1593_v11 }
 0x337   : > { %v3463_v14 = vpop.eup %3462 }
 0x338   : > { %v1595_v17 = vmul.f32 %v3463_v14, %v1587_v1 }
 0x33a   : > { %v1602_v22 = vmul.f32 %v3129_v16, %v1595_v17 }
 0x33c   : > { %v1607_v23 = vadd.f32 %v3130_v21, %v1602_v22 }
 0x33e   : > { %v3854_v24 = vadd.f32 %v1607_v23, %v3733_v0 }
 0x340   : > { %v1640_v25 = vand.u32 4294901760, %v3854_v24 }
 0x342   : > { %3311 = vmatprep.subr.mxu0 %v1640_v25  ;;  %v1727_v26 = vsub.f32 %v3854_v24, %v1640_v25 }
 0x343   : > { %3312 = vmatpush3.msra.mxu0 %v1640_v25 }
 0x344   : > { %3314 = vmatmul.mubr.f32.vlgmr.msra.gmra.mxu0 %v3762_v19  ;;  %3321 = vmatprep.subr.mxu0 %v1727_v26  ;;  %v1728_v28 = vand.u32 4294901760, %v1727_v26 }
 0x345   : > { %3322 = vmatpush3.msra.mxu0 %v1727_v26  ;;  %3323 = vmatprep.mubr.f32.mxu0 %v3744_v9 }
 0x346   : > { %3331 = vmatprep.subr.mxu0 %v1728_v28  ;;  %v1729_v29 = vsub.f32 %v1727_v26, %v1728_v28 }
 0x348   : > { %3324 = vmatmul.mubr.f32.vlgmr.msra.gmra.mxu0 %v3748_v10  ;;  %v1730_v30 = vand.u32 4294901760, %v1729_v29 }
 0x349   : > { %3332 = vmatpush3.msra.mxu0 %v1728_v28  ;;  %3333 = vmatprep.mubr.f32.mxu0 %v3738_v6 }
 0x34a   : > { %3316 = vmatprep.subr.mxu1 %v1730_v30  ;;  %3341 = vmatprep.subr.mxu0 %v3594_v20 }
 0x34b   : > { %3317 = vmatpush3.msra.mxu1 %v1730_v30 }
 0x34c   : > { %3319 = vmatmul.mubr.f32.vlgmr.msra.gmra.mxu1 %v3740_v7  ;;  %3326 = vmatprep.subr.mxu1 %v1640_v25 }
 0x34d   : > { %3327 = vmatpush3.msra.mxu1 %v1640_v25  ;;  %3328 = vmatprep.mubr.f32.mxu1 %v3751_v12 }
 0x34e   : > { %3336 = vmatprep.subr.mxu1 %v1640_v25  ;;  %3334 = vmatmul.mubr.f32.vlgmr.msra.gmra.mxu0 %v3740_v7 }
 0x34f   : > { %3343 = vmatprep.mubr.msk.f32.mxu0 %vm3595_vm1, %v3594_v20 }
 0x350   : > { %3329 = vmatmul.mubr.f32.vlgmr.msra.gmra.mxu1 %v3754_v13 }
 0x351   : > { %3337 = vmatpush3.msra.mxu1 %v1640_v25  ;;  %3338 = vmatprep.mubr.f32.mxu1 %v3738_v6 }
 0x352   : > { %3346 = vmatprep.subr.mxu1 %v3594_v20 }
 0x354   : > { %3339 = vmatmul.mubr.f32.vlgmr.msra.gmra.mxu1 %v3740_v7 }
 0x355   : > { %3348 = vmatprep.mubr.msk.f32.mxu1 %vm3595_vm1, %v3594_v20 }
 0x404   : > { %v3315_v0 = vpop.f32.mrf.mxu0 }
 0x406   : > { %v1681_v9 = vpop.f32.mrf.mxu0 }
 0x408   : > { %v3325_v10 = vpop.f32.mrf.mxu0 }
 0x40a   : > { %v1847_v19 = vpop.f32.mrf.mxu0 }
 0x40c   : > { %v3320_v12 = vpop.f32.mrf.mxu1 }
 0x40d   : > { %v1774_v18 = vadd.f32 %v3320_v12, %v3315_v0 }
 0x40e   : > { %v1767_v31 = vpop.f32.mrf.mxu1  ;;  %v3335_v34 = vpop.f32.mrf.mxu0 }
 0x40f   : > { %v1855_v32 = vadd.f32 %v3325_v10, %v1774_v18  ;;  %v1768_v33 = vadd.f32 %v1767_v31, %v1681_v9 }
 0x410   : > { %v3330_v13 = vpop.f32.mrf.mxu1  ;;  %v2010_v7 = vpop.f32.mrf.mxu0 }
 0x411   : > { %v1848_v36 = vadd.f32 %v1847_v19, %v1768_v33  ;;  %v1937_v6 = vadd.f32 %v3330_v13, %v1855_v32 }
 0x412   : > { %v1928_v37 = vpop.f32.mrf.mxu1 }
 0x413   : > { %v2017_v38 = vadd.f32 %v3335_v34, %v1937_v6  ;;  %v1929_v39 = vadd.f32 %v1928_v37, %v1848_v36 }
 0x414   : > { %v3340_v40 = vpop.f32.mrf.mxu1 }
 0x415   : > { %v2011_v41 = vadd.f32 %v2010_v7, %v1929_v39  ;;  %v2095_v42 = vadd.f32 %v3340_v40, %v2017_v38 }
 0x416   : > { %v2088_v46 = vpop.f32.mrf.mxu1 }
 0x417   : > { %v2089_v47 = vadd.f32 %v2088_v46, %v2011_v41  ;;  %v2101_v48 = vmul.f32 %v2099_v45, %v2095_v42  ;;  %v2104_v49 = vmul.f32 %v2098_v43, %v2095_v42  ;;  %v3131_v46 = vld [vmem:[#allocation5 + $0x41] ss:$0 sm:$0xff] }
 0x419   : > { %v2100_v50 = vmul.f32 %v2098_v43, %v2089_v47  ;;  %v2103_v51 = vmul.f32 %v2099_v45, %v2089_v47 }
 0x41b   : > { %v2102_v52 = vsub.f32 %v2100_v50, %v2101_v48  ;;  %v2105_v54 = vadd.f32 %v2104_v49, %v2103_v51  ;;  %v3132_v48 = vld [vmem:[#allocation5 + $0x49] ss:$0 sm:$0xff] }
 0x41d   : > { %v2137_v55 = vand.u32 4294901760, %v2105_v54  ;;  %v2583_v57 = vand.u32 4294901760, %v2102_v52 }
 0x41f   : > { %v2214_v56 = vsub.f32 %v2105_v54, %v2137_v55  ;;  %3342 = vmatpush3.msra.mxu0 %v2137_v55  ;;  %v2660_v59 = vsub.f32 %v2102_v52, %v2583_v57 }
 0x420   : > { %3344 = vmatmul.mubr.f32.vlgmr.msra.gmra.mxu0 %v3795_v60  ;;  %3351 = vmatprep.subr.mxu0 %v3594_v20 }
 0x421   : > { %3352 = vmatpush3.msra.mxu0 %v2214_v56  ;;  %3353 = vmatprep.mubr.msk.f32.mxu0 %vm3595_vm1, %v3594_v20  ;;  %v2215_v58 = vand.u32 4294901760, %v2214_v56  ;;  %v2661_v60 = vand.u32 4294901760, %v2660_v59 }
 0x422   : > { %3361 = vmatprep.subr.mxu0 %v3594_v20 }
 0x423   : > { %v2216_v61 = vsub.f32 %v2214_v56, %v2215_v58 }
 0x424   : > { %3354 = vmatmul.mubr.f32.vlgmr.msra.gmra.mxu0 %v3785_v35  ;;  %v2662_v35 = vsub.f32 %v2660_v59, %v2661_v60 }
 0x425   : > { %3362 = vmatpush3.msra.mxu0 %v2215_v58  ;;  %v2217_v63 = vand.u32 4294901760, %v2216_v61  ;;  %3363 = vmatprep.mubr.msk.f32.mxu0 %vm3595_vm1, %v3594_v20 }
 0x426   : > { %3371 = vmatprep.subr.mxu0 %v3594_v20  ;;  %v2663_v1 = vand.u32 4294901760, %v2662_v35 }
 0x427   : > { %3347 = vmatpush3.msra.mxu1 %v2217_v63 }
 0x428   : > { %3349 = vmatmul.mubr.f32.vlgmr.msra.gmra.mxu1 %v3782_v27  ;;  %3356 = vmatprep.subr.mxu1 %v3594_v20 }
 0x429   : > { %3364 = vmatmul.mubr.f32.vlgmr.msra.gmra.mxu0 %v3782_v27  ;;  %3357 = vmatpush3.msra.mxu1 %v2137_v55 }
 0x42a   : > { %3372 = vmatpush3.msra.mxu0 %v2583_v57  ;;  %3358 = vmatprep.mubr.msk.f32.mxu1 %vm3595_vm1, %v3594_v20 }
 0x42b   : > { %3366 = vmatprep.subr.mxu1 %v3594_v20  ;;  %3373 = vmatprep.mubr.msk.f32.mxu0 %vm3595_vm1, %v3594_v20 }
 0x42c   : > { %3381 = vmatprep.subr.mxu0 %v3594_v20  ;;  %3359 = vmatmul.mubr.f32.vlgmr.msra.gmra.mxu1 %v3788_v44 }
 0x42d   : > { %3367 = vmatpush3.msra.mxu1 %v2137_v55  ;;  %3374 = vmatmul.mubr.f32.vlgmr.msra.gmra.mxu0 %v3817_v15 }
 0x42e   : > { %3382 = vmatpush3.msra.mxu0 %v2660_v59  ;;  %3368 = vmatprep.mubr.msk.f32.mxu1 %vm3595_vm1, %v3594_v20 }
 0x42f   : > { %3376 = vmatprep.subr.mxu1 %v3594_v20  ;;  %3383 = vmatprep.mubr.msk.f32.mxu0 %vm3595_vm1, %v3594_v20 }
 0x430   : > { %3391 = vmatprep.subr.mxu0 %v3594_v20  ;;  %3369 = vmatmul.mubr.f32.vlgmr.msra.gmra.mxu1 %v3782_v27 }
 0x431   : > { %3377 = vmatpush3.msra.mxu1 %v2663_v1  ;;  %3384 = vmatmul.mubr.f32.vlgmr.msra.gmra.mxu0 %v3798_v62 }
 0x432   : > { %3392 = vmatpush3.msra.mxu0 %v2661_v60  ;;  %3378 = vmatprep.mubr.msk.f32.mxu1 %vm3595_vm1, %v3594_v20 }
 0x433   : > { %3386 = vmatprep.subr.mxu1 %v3594_v20  ;;  %3393 = vmatprep.mubr.msk.f32.mxu0 %vm3595_vm1, %v3594_v20 }
 0x434   : > { %3379 = vmatmul.mubr.f32.vlgmr.msra.gmra.mxu1 %v3793_v53 }
 0x435   : > { %3387 = vmatpush3.msra.mxu1 %v2583_v57  ;;  %3388 = vmatprep.mubr.msk.f32.mxu1 %vm3595_vm1, %v3594_v20 }
 0x436   : > { %3396 = vmatprep.subr.mxu1 %v3594_v20  ;;  %3394 = vmatmul.mubr.f32.vlgmr.msra.gmra.mxu0 %v3793_v53 }
 0x438   : > { %3389 = vmatmul.mubr.f32.vlgmr.msra.gmra.mxu1 %v3805_v3 }
 0x439   : > { %3397 = vmatpush3.msra.mxu1 %v2583_v57  ;;  %3398 = vmatprep.mubr.msk.f32.mxu1 %vm3595_vm1, %v3594_v20 }
 0x43c   : > { %3399 = vmatmul.mubr.f32.vlgmr.msra.gmra.mxu1 %v3793_v53 }
 0x4e0   : > { %v2178_v27 = vpop.f32.mrf.mxu0 }
 0x4e2   : > { %v3345_v44 = vpop.f32.mrf.mxu0 }
 0x4e4   : > { %v2328_v62 = vpop.f32.mrf.mxu0 }
 0x4e6   : > { %v3355_v15 = vpop.f32.mrf.mxu0 }
 0x4e8   : > { %v2254_v2 = vpop.f32.mrf.mxu1 }
 0x4e9   : > { %v2255_v4 = vadd.f32 %v2254_v2, %v2178_v27  ;;  %v2476_v5 = vpop.f32.mrf.mxu0 }
 0x4ea   : > { %v3350_v8 = vpop.f32.mrf.mxu1 }
 0x4eb   : > { %v2329_v11 = vadd.f32 %v2328_v62, %v2255_v4  ;;  %v3365_v14 = vpop.f32.mrf.mxu0 }
 0x4ec   : > { %v2402_v16 = vpop.f32.mrf.mxu1 }
 0x4ed   : > { %v2403_v17 = vadd.f32 %v2402_v16, %v2329_v11  ;;  %v2624_v21 = vpop.f32.mrf.mxu0 }
 0x4ee   : > { %v3360_v3 = vpop.f32.mrf.mxu1 }
 0x4ef   : > { %v2477_v22 = vadd.f32 %v2476_v5, %v2403_v17  ;;  %v3375_v23 = vpop.f32.mrf.mxu0 }
 0x4f0   : > { %v2548_v25 = vpop.f32.mrf.mxu1 }
 0x4f1   : > { %v2549_v20 = vadd.f32 %v2548_v25, %v2477_v22  ;;  %v2774_v26 = vpop.f32.mrf.mxu0 }
 0x4f2   : > { %v3370_v53 = vpop.f32.mrf.mxu1 }
 0x4f3   : > { %v2625_v28 = vadd.f32 %v2624_v21, %v2549_v20  ;;  %v3385_v29 = vpop.f32.mrf.mxu0 }
 0x4f4   : > { %v2700_v30 = vpop.f32.mrf.mxu1 }
 0x4f5   : > { %v2701_v0 = vadd.f32 %v2700_v30, %v2625_v28 }
 0x4f6   : > { %v3380_v9 = vpop.f32.mrf.mxu1  ;;  %v2922_v10 = vpop.f32.mrf.mxu0 }
 0x4f7   : > { %v2775_v12 = vadd.f32 %v2774_v26, %v2701_v0 }
 0x4f8   : > { %v2848_v19 = vpop.f32.mrf.mxu1  ;;  %v3395_v18 = vpop.f32.mrf.mxu0 }
 0x4f9   : > { %v2849_v31 = vadd.f32 %v2848_v19, %v2775_v12 }
 0x4fa   : > { %v3390_v32 = vpop.f32.mrf.mxu1 }
 0x4fb   : > { %v2923_v33 = vadd.f32 %v2922_v10, %v2849_v31 }
 0x4fc   : > { %v2994_v13 = vpop.f32.mrf.mxu1 }
 0x4fd   : > { %v2995_v34 = vadd.f32 %v2994_v13, %v2923_v33 }
 0x4fe   : > { %v3400_v36 = vpop.f32.mrf.mxu1 }
 0x4ff   : > { %v2998_v6 = vsel %vm1581_vm2, %v2995_v34, 0.0 }
 0x500   : > { %2999 = vadd.xlane.f32.xlu1 %v2998_v6 }
 0x589   : > { %v3000_v37 = vpop.xlane.xlu1 %2999 }
 0x58a   : > { %v3001_v38 = vmul.f32 0.03125, %v3000_v37 }
 0x58c   : > { %v3002_v39 = vsub.f32 %v2995_v34, %v3001_v38 }
 0x58e   : > { %v3003_v7 = vmul.f32 %v3002_v39, %v3002_v39 }
 0x590   : > { %v3004_v40 = vsel %vm1581_vm2, %v3003_v7, 0.0 }
 0x591   : > { %3005 = vadd.xlane.f32.xlu1 %v3004_v40 }
 0x61a   : > { %v3006_v41 = vpop.xlane.xlu1 %3005 }
 0x61b   : > { %v3007_v42 = vmul.f32 0.03125, %v3006_v41 }
 0x61d   : > { %v3008_v43 = vadd.f32 1e-12, %v3007_v42 }
 0x61f   : > { %3464 = vrsqrt.f32 %v3008_v43 }
 0x62c   : > { %v3465_v45 = vpop.eup %3464 }
 0x62d   : > { %v3010_v47 = vmul.f32 %v3465_v45, %v3002_v39 }
 0x62f   : > { %v3017_v49 = vmul.f32 %v3131_v46, %v3010_v47 }
 0x631   : > { %v3022_v50 = vadd.f32 %v3132_v48, %v3017_v49 }
 0x633   : > { %v3023_v51 = vadd.f32 %v3022_v50, %v3854_v24 }
 0x635   : > { %3024 = vst.msk [vmem:[%s173_s17] sm:$0xff] %vm1581_vm2, %v3023_v51 }
 0x636   : > { %3533 = shalt.err (!%p3530_p0)
}
 0x637   : > { %s3534_s27 = scalar_lea.hbm %s3037_s20, 128  ;;  %s3538_s4 = scalar_lea.hbm %s3959_s2, 256 }
 0x638   : > { %p3535_p5 = scmp.ne.s32.totalorder %s3037_s20, %s3534_s27  ;;  %p3539_p1 = scmp.lt.s32.totalorder %s3037_s20, %s3959_s2 }
 0x639   : > { %p3540_p4 = scmp.lt.s32.totalorder %s3538_s4, %s3534_s27 }
 0x63a   : > { %p3536_p9 = pnand %p3535_p5, %p3975_p3 }
 0x63b   : > { %p3541_p6 = por %p3540_p4, %p3539_p1 }
 0x63c   : > { %p3537_p12 = pneg %p3536_p9 }
 0x63e   : > { %p3542_p8 = pnand %p3541_p6, %p3537_p12 }
 0x640   : > { %3545 = shalt.err (!%p3542_p8)
}
 0x641   : > { %3407 = dma.vmem_to_hbm [thread:$0]  (%p3975_p3), %s3040_s8, 128, %s3037_s20, %s3026_s23  }
 0x642 PF: > { %s3051_s7 = sand.u32 1, %s3576_s9   ;;  %p3976_p11 = scmp.ne.s32.totalorder %s3965_s16, 0 }
 0x643   : > { %p3977_p7 = scmp.ge.s32.totalorder %s3588_s12, 2  ;;  %s3052_s14 = scalar_lea.sflag [#allocation4], %s3051_s7 }
 0x645   : > { %p3418_p10 = pnand %p3977_p7, %p3976_p11 }
 0x647   : > { %p3419_p2 = pneg %p3418_p10 }
 0x649   : > { %3571 = dma.done.wait (%p3419_p2), %s3052_s14, 128  }
 0x64a   : > { %3573 = vsyncadd (%p3419_p2), %s3052_s14, 4294967168  ;;  %p16_p13 = scmp.ge.s32.totalorder %s3666_s21, 4   ;;  %s3978_s9 = smov %s3580_s10 }
 0x64b   : > { %s3979_s10 = smov %s3584_s11  ;;  %s3980_s11 = smov %s3683_s29 }
 0x64c   : > { %s3981_s12 = smov %s3666_s21  ;;  %18 = sbr.rel (!%p16_p13) target bundleno = 6 (0x6), region = 77 }
 0x651   :  { %3057 = vsyncpa [#allocation3], 1 }
 0x652   :  { %3059 = vsyncpa [#allocation3 + $0x1], 1 }
 0x653   :  { %3060 = vsyncpa [#allocation6], 1 }
 0x654   :  { %3061 = vsyncpa [#allocation4], 1 }
 0x655   :  { %3063 = vsyncpa [#allocation4 + $0x1], 1 }

</bundles_post_ra>
